<compile_context>
chip_gen: v7x
topology: tpu7x:2x2x1
jax: 0.10.0
libtpu: 0.0.40
codegen_flags: <defaults>
</compile_context>

<pallas_src>
import functools

import jax
import jax.numpy as jnp
from jax.experimental import pallas as pl
from jax.experimental.pallas import tpu as pltpu

LN_EPS = 1e-5
SOFTPLUS_THRESHOLD = 20.0
LANE = 128      # lane width (last-dim padding target)
SUBLANE = 8     # f32 sublane count (batch-tile granularity)


def _round_up(x, m):
    return ((x + m - 1) // m) * m


def _make_fused_decoder_kernel(num_hidden, hidden_real_dout):
    """Build the fused kernel body.

    Kernel args: (x_ref, w0, b0, w1, b1, ..., wL, bL, o_ref).
    Feature dims are padded to multiples of 128; padded weight rows/cols and
    padded bias entries are zero, so:
      * padded columns of every pre-LN activation y are exactly 0
        (plain lane-sum == sum over real features for the mean), and
      * garbage in padded activation lanes is killed by zero weight rows
        of the next layer.
    Only the variance needs an explicit lane mask.
    """

    def kernel(x_ref, *refs):
        o_ref = refs[-1]
        p = refs[:-1]
        h = x_ref[...]

        # Hidden layers: Linear -> LayerNorm(no affine) -> ReLU
        for li in range(num_hidden):
            w = p[2 * li][...]
            b = p[2 * li + 1][...]
            y = jnp.dot(h, w, preferred_element_type=jnp.float32) + b
            d_real = hidden_real_dout[li]
            d_pad = y.shape[-1]
            inv_d = jnp.float32(1.0 / d_real)
            # Padded cols of y are exactly zero -> plain sum is correct.
            mean = jnp.sum(y, axis=-1, keepdims=True) * inv_d
            centered = y - mean
            if d_pad != d_real:
                lane_idx = jax.lax.broadcasted_iota(jnp.int32, y.shape, 1)
                centered_m = jnp.where(lane_idx < d_real, centered, 0.0)
            else:
                centered_m = centered
            var = jnp.sum(centered_m * centered_m, axis=-1, keepdims=True) * inv_d
            h = jnp.maximum(centered * jax.lax.rsqrt(var + LN_EPS), 0.0)

        # Final layer: Linear -> Softplus (beta=1, threshold=20)
        w = p[2 * num_hidden][...]
        b = p[2 * num_hidden + 1][...]
        ld = jnp.dot(h, w, preferred_element_type=jnp.float32) + b
        safe = jnp.minimum(ld, SOFTPLUS_THRESHOLD)
        sp = jnp.log1p(jnp.exp(safe))
        o_ref[...] = jnp.where(ld > SOFTPLUS_THRESHOLD, ld, sp).astype(o_ref.dtype)

    return kernel


@jax.jit
def decoder_forward(params, z):
    n, z_dim = z.shape
    hidden = list(params["hidden"])
    layers = hidden + [params["h2ld"]]
    num_hidden = len(hidden)

    real_in = [w.shape[0] for (w, _) in layers]
    real_out = [w.shape[1] for (w, _) in layers]
    pad_in = [_round_up(d, LANE) for d in real_in]
    pad_out = [_round_up(d, LANE) for d in real_out]

    # Batch tile: multiple of the f32 sublane; capped so the activation slab
    # stays small even on v7x's 64 MiB VMEM (256 x 128 f32 = 128 KiB/buffer).
    tile_n = 256 if n >= 256 else _round_up(n, SUBLANE)
    n_pad = _round_up(n, tile_n)

    # Lane-dense, zero-padded input / weights / biases.
    z_p = jnp.pad(z.astype(jnp.float32),
                  ((0, n_pad - n), (0, pad_in[0] - z_dim)))
    padded_params = []
    for (w, b), di, do, pdi, pdo in zip(layers, real_in, real_out, pad_in, pad_out):
        wp = jnp.pad(w.astype(jnp.float32), ((0, pdi - di), (0, pdo - do)))
        bp = jnp.pad(b.astype(jnp.float32), (0, pdo - do)).reshape(1, pdo)
        padded_params += [wp, bp]

    in_specs = [pl.BlockSpec((tile_n, pad_in[0]), lambda i: (i, 0))]
    for pdi, pdo in zip(pad_in, pad_out):
        in_specs.append(pl.BlockSpec((pdi, pdo), lambda i: (0, 0)))   # weight (resident)
        in_specs.append(pl.BlockSpec((1, pdo), lambda i: (0, 0)))     # bias   (resident)

    kernel = _make_fused_decoder_kernel(num_hidden, tuple(real_out[:num_hidden]))

    out_p = pl.pallas_call(
        kernel,
        out_shape=jax.ShapeDtypeStruct((n_pad, pad_out[-1]), jnp.float32),
        grid=(n_pad // tile_n,),
        in_specs=in_specs,
        out_specs=pl.BlockSpec((tile_n, pad_out[-1]), lambda i: (i, 0)),
        compiler_params=pltpu.CompilerParams(
            dimension_semantics=("parallel",)),
    )(z_p, *padded_params)

    # Strip batch and lane padding.
    return out_p[:n, :real_out[-1]]


def init_decoder_params(key, num_h_layers, z_dim, h_dim, x_dim):
    """Deterministic parameter init (uniform, PyTorch-Linear-like scale)."""
    params = {"hidden": []}

    def linear_init(k, din, dout):
        kw, kb = jax.random.split(k)
        bound = 1.0 / jnp.sqrt(din)
        w = jax.random.uniform(kw, (din, dout), jnp.float32, -bound, bound)
        b = jax.random.uniform(kb, (dout,), jnp.float32, -bound, bound)
        return w, b

    keys = jax.random.split(key, num_h_layers + 1)
    # z2h: LinearReLU(z_dim, h_dim)
    params["hidden"].append(linear_init(keys[0], z_dim, h_dim))
    # seq_nn: (num_h_layers - 1) x LinearReLU(h_dim, h_dim)
    for i in range(num_h_layers - 1):
        params["hidden"].append(linear_init(keys[1 + i], h_dim, h_dim))
    # h2ld: Linear(h_dim, x_dim)
    params["h2ld"] = linear_init(keys[num_h_layers], h_dim, x_dim)
    return params


def decoder_forward_ref(params, z):
    """Pure-JAX reference for sanity check."""
    h = z
    for (w, b) in params["hidden"]:
        y = h @ w + b
        mean = jnp.mean(y, axis=-1, keepdims=True)
        var = jnp.mean((y - mean) ** 2, axis=-1, keepdims=True)
        y = (y - mean) / jnp.sqrt(var + LN_EPS)
        h = jnp.maximum(y, 0.0)
    w, b = params["h2ld"]
    y = h @ w + b
    return jnp.where(y > SOFTPLUS_THRESHOLD, y,
                     jnp.log1p(jnp.exp(jnp.minimum(y, SOFTPLUS_THRESHOLD))))


if __name__ == "__main__":
    num_h_layers = 3
    z_dim, h_dim, x_dim = 16, 32, 8
    batch = 8

    key = jax.random.PRNGKey(0)
    kp, kz = jax.random.split(key)
    params = init_decoder_params(kp, num_h_layers, z_dim, h_dim, x_dim)
    z = jax.random.normal(kz, (batch, z_dim), jnp.float32)

    out = decoder_forward(params, z)
    out = jax.block_until_ready(out)

    ref = decoder_forward_ref(params, z)
    assert out.shape == (batch, x_dim)
    assert jnp.allclose(out, ref, atol=1e-4, rtol=1e-5), "mismatch vs reference"

    print("KERNEL_OK")
</pallas_src>

<mosaic_0001>
module attributes {stable_mosaic.version = 11 : i64} {
  func.func @kernel(%arg0: i32, %arg1: memref<8x128xf32, #tpu.memory_space<vmem>>, %arg2: memref<128x128xf32, #tpu.memory_space<vmem>>, %arg3: memref<1x128xf32, #tpu.memory_space<vmem>>, %arg4: memref<128x128xf32, #tpu.memory_space<vmem>>, %arg5: memref<1x128xf32, #tpu.memory_space<vmem>>, %arg6: memref<128x128xf32, #tpu.memory_space<vmem>>, %arg7: memref<1x128xf32, #tpu.memory_space<vmem>>, %arg8: memref<128x128xf32, #tpu.memory_space<vmem>>, %arg9: memref<1x128xf32, #tpu.memory_space<vmem>>, %arg10: memref<8x128xf32, #tpu.memory_space<vmem>>) attributes {dimension_semantics = [#tpu.dimension_semantics<parallel>], iteration_bounds = array<i64: 1>, scalar_prefetch = 0 : i64, scratch_operands = 0 : i64, tpu.core_type = #tpu.core_type<tc>, window_params = [{transform_indices = @transform_0, window_bounds = array<i64: 8, 128>}, {pipeline_mode = #tpu.pipeline_mode<synchronous>, transform_indices = @transform_1, window_bounds = array<i64: 128, 128>}, {pipeline_mode = #tpu.pipeline_mode<synchronous>, transform_indices = @transform_2, window_bounds = array<i64: 1, 128>}, {pipeline_mode = #tpu.pipeline_mode<synchronous>, transform_indices = @transform_3, window_bounds = array<i64: 128, 128>}, {pipeline_mode = #tpu.pipeline_mode<synchronous>, transform_indices = @transform_4, window_bounds = array<i64: 1, 128>}, {pipeline_mode = #tpu.pipeline_mode<synchronous>, transform_indices = @transform_5, window_bounds = array<i64: 128, 128>}, {pipeline_mode = #tpu.pipeline_mode<synchronous>, transform_indices = @transform_6, window_bounds = array<i64: 1, 128>}, {pipeline_mode = #tpu.pipeline_mode<synchronous>, transform_indices = @transform_7, window_bounds = array<i64: 128, 128>}, {pipeline_mode = #tpu.pipeline_mode<synchronous>, transform_indices = @transform_8, window_bounds = array<i64: 1, 128>}, {transform_indices = @transform_9, window_bounds = array<i64: 8, 128>}]} {
    %c0 = arith.constant 0 : index
    %c0_0 = arith.constant 0 : index
    %0 = vector.load %arg1[%c0, %c0_0] : memref<8x128xf32, #tpu.memory_space<vmem>>, vector<8x128xf32>
    %c0_1 = arith.constant 0 : index
    %c0_2 = arith.constant 0 : index
    %1 = vector.load %arg2[%c0_1, %c0_2] : memref<128x128xf32, #tpu.memory_space<vmem>>, vector<128x128xf32>
    %c0_3 = arith.constant 0 : index
    %c0_4 = arith.constant 0 : index
    %2 = vector.load %arg3[%c0_3, %c0_4] : memref<1x128xf32, #tpu.memory_space<vmem>>, vector<1x128xf32>
    %cst = arith.constant dense<0.000000e+00> : vector<8x128xf32>
    %3 = tpu.matmul %0, %1, %cst {dimension_numbers = #tpu.dot_dimension_numbers<[1], [0], [0], [1], [0, 0, 1, 1], [], []>} : vector<8x128xf32>, vector<128x128xf32>, vector<8x128xf32> -> vector<8x128xf32>
    %4 = vector.broadcast %2 : vector<1x128xf32> to vector<8x128xf32>
    %5 = arith.addf %3, %4 : vector<8x128xf32>
    %cst_5 = arith.constant dense<0.000000e+00> : vector<8xf32>
    %6 = vector.multi_reduction <add>, %5, %cst_5 [1] : vector<8x128xf32> to vector<8xf32>
    %7 = vector.shape_cast %6 : vector<8xf32> to vector<8x1xf32>
    %cst_6 = arith.constant 3.125000e-02 : f32
    %8 = vector.broadcast %cst_6 : f32 to vector<8x1xf32>
    %9 = arith.mulf %7, %8 : vector<8x1xf32>
    %10 = vector.broadcast %9 : vector<8x1xf32> to vector<8x128xf32>
    %11 = arith.subf %5, %10 : vector<8x128xf32>
    %12 = tpu.iota {dimensions = array<i32: 1>} : vector<8x128xi32>
    %c32_i32 = arith.constant 32 : i32
    %13 = vector.broadcast %c32_i32 : i32 to vector<8x128xi32>
    %14 = arith.cmpi slt, %12, %13 : vector<8x128xi32>
    %cst_7 = arith.constant 0.000000e+00 : f32
    %15 = vector.broadcast %cst_7 : f32 to vector<8x128xf32>
    %16 = arith.select %14, %11, %15 : vector<8x128xi1>, vector<8x128xf32>
    %17 = arith.mulf %16, %16 : vector<8x128xf32>
    %cst_8 = arith.constant dense<0.000000e+00> : vector<8xf32>
    %18 = vector.multi_reduction <add>, %17, %cst_8 [1] : vector<8x128xf32> to vector<8xf32>
    %19 = vector.shape_cast %18 : vector<8xf32> to vector<8x1xf32>
    %cst_9 = arith.constant 3.125000e-02 : f32
    %20 = vector.broadcast %cst_9 : f32 to vector<8x1xf32>
    %21 = arith.mulf %19, %20 : vector<8x1xf32>
    %cst_10 = arith.constant 9.99999974E-6 : f32
    %22 = vector.broadcast %cst_10 : f32 to vector<8x1xf32>
    %23 = arith.addf %21, %22 : vector<8x1xf32>
    %24 = math.rsqrt %23 : vector<8x1xf32>
    %25 = vector.broadcast %24 : vector<8x1xf32> to vector<8x128xf32>
    %26 = arith.mulf %11, %25 : vector<8x128xf32>
    %cst_11 = arith.constant 0.000000e+00 : f32
    %27 = vector.broadcast %cst_11 : f32 to vector<8x128xf32>
    %28 = arith.maximumf %26, %27 : vector<8x128xf32>
    %c0_12 = arith.constant 0 : index
    %c0_13 = arith.constant 0 : index
    %29 = vector.load %arg4[%c0_12, %c0_13] : memref<128x128xf32, #tpu.memory_space<vmem>>, vector<128x128xf32>
    %c0_14 = arith.constant 0 : index
    %c0_15 = arith.constant 0 : index
    %30 = vector.load %arg5[%c0_14, %c0_15] : memref<1x128xf32, #tpu.memory_space<vmem>>, vector<1x128xf32>
    %cst_16 = arith.constant dense<0.000000e+00> : vector<8x128xf32>
    %31 = tpu.matmul %28, %29, %cst_16 {dimension_numbers = #tpu.dot_dimension_numbers<[1], [0], [0], [1], [0, 0, 1, 1], [], []>} : vector<8x128xf32>, vector<128x128xf32>, vector<8x128xf32> -> vector<8x128xf32>
    %32 = vector.broadcast %30 : vector<1x128xf32> to vector<8x128xf32>
    %33 = arith.addf %31, %32 : vector<8x128xf32>
    %cst_17 = arith.constant dense<0.000000e+00> : vector<8xf32>
    %34 = vector.multi_reduction <add>, %33, %cst_17 [1] : vector<8x128xf32> to vector<8xf32>
    %35 = vector.shape_cast %34 : vector<8xf32> to vector<8x1xf32>
    %cst_18 = arith.constant 3.125000e-02 : f32
    %36 = vector.broadcast %cst_18 : f32 to vector<8x1xf32>
    %37 = arith.mulf %35, %36 : vector<8x1xf32>
    %38 = vector.broadcast %37 : vector<8x1xf32> to vector<8x128xf32>
    %39 = arith.subf %33, %38 : vector<8x128xf32>
    %40 = tpu.iota {dimensions = array<i32: 1>} : vector<8x128xi32>
    %c32_i32_19 = arith.constant 32 : i32
    %41 = vector.broadcast %c32_i32_19 : i32 to vector<8x128xi32>
    %42 = arith.cmpi slt, %40, %41 : vector<8x128xi32>
    %cst_20 = arith.constant 0.000000e+00 : f32
    %43 = vector.broadcast %cst_20 : f32 to vector<8x128xf32>
    %44 = arith.select %42, %39, %43 : vector<8x128xi1>, vector<8x128xf32>
    %45 = arith.mulf %44, %44 : vector<8x128xf32>
    %cst_21 = arith.constant dense<0.000000e+00> : vector<8xf32>
    %46 = vector.multi_reduction <add>, %45, %cst_21 [1] : vector<8x128xf32> to vector<8xf32>
    %47 = vector.shape_cast %46 : vector<8xf32> to vector<8x1xf32>
    %cst_22 = arith.constant 3.125000e-02 : f32
    %48 = vector.broadcast %cst_22 : f32 to vector<8x1xf32>
    %49 = arith.mulf %47, %48 : vector<8x1xf32>
    %cst_23 = arith.constant 9.99999974E-6 : f32
    %50 = vector.broadcast %cst_23 : f32 to vector<8x1xf32>
    %51 = arith.addf %49, %50 : vector<8x1xf32>
    %52 = math.rsqrt %51 : vector<8x1xf32>
    %53 = vector.broadcast %52 : vector<8x1xf32> to vector<8x128xf32>
    %54 = arith.mulf %39, %53 : vector<8x128xf32>
    %cst_24 = arith.constant 0.000000e+00 : f32
    %55 = vector.broadcast %cst_24 : f32 to vector<8x128xf32>
    %56 = arith.maximumf %54, %55 : vector<8x128xf32>
    %c0_25 = arith.constant 0 : index
    %c0_26 = arith.constant 0 : index
    %57 = vector.load %arg6[%c0_25, %c0_26] : memref<128x128xf32, #tpu.memory_space<vmem>>, vector<128x128xf32>
    %c0_27 = arith.constant 0 : index
    %c0_28 = arith.constant 0 : index
    %58 = vector.load %arg7[%c0_27, %c0_28] : memref<1x128xf32, #tpu.memory_space<vmem>>, vector<1x128xf32>
    %cst_29 = arith.constant dense<0.000000e+00> : vector<8x128xf32>
    %59 = tpu.matmul %56, %57, %cst_29 {dimension_numbers = #tpu.dot_dimension_numbers<[1], [0], [0], [1], [0, 0, 1, 1], [], []>} : vector<8x128xf32>, vector<128x128xf32>, vector<8x128xf32> -> vector<8x128xf32>
    %60 = vector.broadcast %58 : vector<1x128xf32> to vector<8x128xf32>
    %61 = arith.addf %59, %60 : vector<8x128xf32>
    %cst_30 = arith.constant dense<0.000000e+00> : vector<8xf32>
    %62 = vector.multi_reduction <add>, %61, %cst_30 [1] : vector<8x128xf32> to vector<8xf32>
    %63 = vector.shape_cast %62 : vector<8xf32> to vector<8x1xf32>
    %cst_31 = arith.constant 3.125000e-02 : f32
    %64 = vector.broadcast %cst_31 : f32 to vector<8x1xf32>
    %65 = arith.mulf %63, %64 : vector<8x1xf32>
    %66 = vector.broadcast %65 : vector<8x1xf32> to vector<8x128xf32>
    %67 = arith.subf %61, %66 : vector<8x128xf32>
    %68 = tpu.iota {dimensions = array<i32: 1>} : vector<8x128xi32>
    %c32_i32_32 = arith.constant 32 : i32
    %69 = vector.broadcast %c32_i32_32 : i32 to vector<8x128xi32>
    %70 = arith.cmpi slt, %68, %69 : vector<8x128xi32>
    %cst_33 = arith.constant 0.000000e+00 : f32
    %71 = vector.broadcast %cst_33 : f32 to vector<8x128xf32>
    %72 = arith.select %70, %67, %71 : vector<8x128xi1>, vector<8x128xf32>
    %73 = arith.mulf %72, %72 : vector<8x128xf32>
    %cst_34 = arith.constant dense<0.000000e+00> : vector<8xf32>
    %74 = vector.multi_reduction <add>, %73, %cst_34 [1] : vector<8x128xf32> to vector<8xf32>
    %75 = vector.shape_cast %74 : vector<8xf32> to vector<8x1xf32>
    %cst_35 = arith.constant 3.125000e-02 : f32
    %76 = vector.broadcast %cst_35 : f32 to vector<8x1xf32>
    %77 = arith.mulf %75, %76 : vector<8x1xf32>
    %cst_36 = arith.constant 9.99999974E-6 : f32
    %78 = vector.broadcast %cst_36 : f32 to vector<8x1xf32>
    %79 = arith.addf %77, %78 : vector<8x1xf32>
    %80 = math.rsqrt %79 : vector<8x1xf32>
    %81 = vector.broadcast %80 : vector<8x1xf32> to vector<8x128xf32>
    %82 = arith.mulf %67, %81 : vector<8x128xf32>
    %cst_37 = arith.constant 0.000000e+00 : f32
    %83 = vector.broadcast %cst_37 : f32 to vector<8x128xf32>
    %84 = arith.maximumf %82, %83 : vector<8x128xf32>
    %c0_38 = arith.constant 0 : index
    %c0_39 = arith.constant 0 : index
    %85 = vector.load %arg8[%c0_38, %c0_39] : memref<128x128xf32, #tpu.memory_space<vmem>>, vector<128x128xf32>
    %c0_40 = arith.constant 0 : index
    %c0_41 = arith.constant 0 : index
    %86 = vector.load %arg9[%c0_40, %c0_41] : memref<1x128xf32, #tpu.memory_space<vmem>>, vector<1x128xf32>
    %cst_42 = arith.constant dense<0.000000e+00> : vector<8x128xf32>
    %87 = tpu.matmul %84, %85, %cst_42 {dimension_numbers = #tpu.dot_dimension_numbers<[1], [0], [0], [1], [0, 0, 1, 1], [], []>} : vector<8x128xf32>, vector<128x128xf32>, vector<8x128xf32> -> vector<8x128xf32>
    %88 = vector.broadcast %86 : vector<1x128xf32> to vector<8x128xf32>
    %89 = arith.addf %87, %88 : vector<8x128xf32>
    %cst_43 = arith.constant 2.000000e+01 : f32
    %90 = vector.broadcast %cst_43 : f32 to vector<8x128xf32>
    %91 = arith.minimumf %89, %90 : vector<8x128xf32>
    %92 = math.exp %91 : vector<8x128xf32>
    %93 = math.log1p %92 : vector<8x128xf32>
    %cst_44 = arith.constant 2.000000e+01 : f32
    %94 = vector.broadcast %cst_44 : f32 to vector<8x128xf32>
    %95 = arith.cmpf ogt, %89, %94 : vector<8x128xf32>
    %96 = arith.select %95, %89, %93 : vector<8x128xi1>, vector<8x128xf32>
    %c0_45 = arith.constant 0 : index
    %c0_46 = arith.constant 0 : index
    %97 = vector.load %arg10[%c0_45, %c0_46] : memref<8x128xf32, #tpu.memory_space<vmem>>, vector<8x128xf32>
    tpu.vector_store %arg10[%c0_45, %c0_46], %96 {strides = array<i32>} : memref<8x128xf32, #tpu.memory_space<vmem>>, vector<8x128xf32>,
    return
  }
  func.func @transform_0(%arg0: i32) -> (i32, i32) {
    %c0_i32 = arith.constant 0 : i32
    %c0_i32_0 = arith.constant 0 : i32
    return %arg0, %c0_i32 : i32, i32
  }
  func.func @transform_1(%arg0: i32) -> (i32, i32) {
    %c0_i32 = arith.constant 0 : i32
    %c0_i32_0 = arith.constant 0 : i32
    %c0_i32_1 = arith.constant 0 : i32
    return %c0_i32, %c0_i32_0 : i32, i32
  }
  func.func @transform_2(%arg0: i32) -> (i32, i32) {
    %c0_i32 = arith.constant 0 : i32
    %c0_i32_0 = arith.constant 0 : i32
    %c0_i32_1 = arith.constant 0 : i32
    return %c0_i32, %c0_i32_0 : i32, i32
  }
  func.func @transform_3(%arg0: i32) -> (i32, i32) {
    %c0_i32 = arith.constant 0 : i32
    %c0_i32_0 = arith.constant 0 : i32
    %c0_i32_1 = arith.constant 0 : i32
    return %c0_i32, %c0_i32_0 : i32, i32
  }
  func.func @transform_4(%arg0: i32) -> (i32, i32) {
    %c0_i32 = arith.constant 0 : i32
    %c0_i32_0 = arith.constant 0 : i32
    %c0_i32_1 = arith.constant 0 : i32
    return %c0_i32, %c0_i32_0 : i32, i32
  }
  func.func @transform_5(%arg0: i32) -> (i32, i32) {
    %c0_i32 = arith.constant 0 : i32
    %c0_i32_0 = arith.constant 0 : i32
    %c0_i32_1 = arith.constant 0 : i32
    return %c0_i32, %c0_i32_0 : i32, i32
  }
  func.func @transform_6(%arg0: i32) -> (i32, i32) {
    %c0_i32 = arith.constant 0 : i32
    %c0_i32_0 = arith.constant 0 : i32
    %c0_i32_1 = arith.constant 0 : i32
    return %c0_i32, %c0_i32_0 : i32, i32
  }
  func.func @transform_7(%arg0: i32) -> (i32, i32) {
    %c0_i32 = arith.constant 0 : i32
    %c0_i32_0 = arith.constant 0 : i32
    %c0_i32_1 = arith.constant 0 : i32
    return %c0_i32, %c0_i32_0 : i32, i32
  }
  func.func @transform_8(%arg0: i32) -> (i32, i32) {
    %c0_i32 = arith.constant 0 : i32
    %c0_i32_0 = arith.constant 0 : i32
    %c0_i32_1 = arith.constant 0 : i32
    return %c0_i32, %c0_i32_0 : i32, i32
  }
  func.func @transform_9(%arg0: i32) -> (i32, i32) {
    %c0_i32 = arith.constant 0 : i32
    %c0_i32_0 = arith.constant 0 : i32
    return %arg0, %c0_i32 : i32, i32
  }
}

</mosaic_0001>

<bundles_post_ra>
// kernel: decoder_forward.1
= control target key start
LH: loop header
LB: loop body
LE: loop exit
PB: predicated region body
PF: predicated region fallthrough
CT: control target
= control target key end

     0   :  { %v823_v3 = vmov 0.0|0.0   ;;  %vm824_vm0 = vmmov 0   ;;  %v825_v6 = vmov 0.0   ;;  %s1145_s0 = inlined_call_operand.vmem [shape: f32[8,128], index: 0, kind: input, shape index: {}]   ;;  %s1146_s1 = inlined_call_operand.vmem [shape: f32[128,128], index: 1, kind: input, shape index: {}]   ;;  %s1147_s2 = inlined_call_operand.vmem [shape: f32[1,128], index: 2, kind: input, shape index: {}]   ;;  %s1148_s3 = inlined_call_operand.vmem [shape: f32[128,128], index: 3, kind: input, shape index: {}]   ;;  %s1149_s4 = inlined_call_operand.vmem [shape: f32[1,128], index: 4, kind: input, shape index: {}]   ;;  %s1150_s5 = inlined_call_operand.vmem [shape: f32[128,128], index: 5, kind: input, shape index: {}]   ;;  %s1151_s6 = inlined_call_operand.vmem [shape: f32[1,128], index: 6, kind: input, shape index: {}]   ;;  %s1152_s7 = inlined_call_operand.vmem [shape: f32[128,128], index: 7, kind: input, shape index: {}]   ;;  %s1153_s8 = inlined_call_operand.vmem [shape: f32[1,128], index: 8, kind: input, shape index: {}]   ;;  %s1154_s9 = inlined_call_operand.hbm [shape: f32[8,128], index: 9, kind: output, shape index: {}]  }
   0x1   :  { %v34_v0 = vld [vmem:[%s1146_s1] sm:$0xff]  ;;  %v35_v1 = vld [vmem:[%s1146_s1 + $0x8] sm:$0xff]  ;;  %v36_v2 = vld [vmem:[%s1146_s1 + $0x10] sm:$0xff]  ;;  %689 = vmatprep.subr.bf16.mxu0 %v823_v3  ;;  %581 = vmatprep.mubr.msk.f32.mxu0 %vm824_vm0, %v825_v6 }
   0x2   :  { %v690_v4 = vpack.c.bf16 %v35_v1, %v34_v0  ;;  %v37_v5 = vld [vmem:[%s1146_s1 + $0x18] sm:$0xff]  ;;  %713 = vmatprep.subr.bf16.mxu1 %v823_v3  ;;  %616 = vmatprep.mubr.msk.f32.mxu1 %vm824_vm0, %v825_v6  ;;  %v38_v8 = vld [vmem:[%s1146_s1 + $0x20] sm:$0xff]  ;;  %v39_v9 = vld [vmem:[%s1146_s1 + $0x28] sm:$0xff] }
   0x3   :  { %v693_v7 = vpack.c.bf16 %v37_v5, %v36_v2 }
   0x4   :  { %691 = vmatpush3.bf16.msra.mxu0 %v690_v4 }
   0x5   :  { %692 = vmatprep.subr.bf16.mxu0 %v823_v3 }
   0x6   :  { %14 = vsyncpa [#allocation3], 0  ;;  %v696_v10 = vpack.c.bf16 %v39_v9, %v38_v8  ;;  %v40_v11 = vld [vmem:[%s1146_s1 + $0x30] sm:$0xff]  ;;  %v41_v12 = vld [vmem:[%s1146_s1 + $0x38] sm:$0xff]  ;;  %v131_v40 = vlaneseq }
   0x7   :  { %v699_v13 = vpack.c.bf16 %v41_v12, %v40_v11  ;;  %v42_v14 = vld [vmem:[%s1146_s1 + $0x40] sm:$0xff]  ;;  %v43_v15 = vld [vmem:[%s1146_s1 + $0x48] sm:$0xff]  ;;  %v44_v17 = vld [vmem:[%s1146_s1 + $0x50] sm:$0xff] }
   0x8   :  { %694 = vmatpush3.bf16.msra.mxu0 %v693_v7  ;;  %v702_v16 = vpack.c.bf16 %v43_v15, %v42_v14  ;;  %v45_v18 = vld [vmem:[%s1146_s1 + $0x58] sm:$0xff]  ;;  %v46_v20 = vld [vmem:[%s1146_s1 + $0x60] sm:$0xff]  ;;  %v47_v21 = vld [vmem:[%s1146_s1 + $0x68] sm:$0xff]  ;;  %v968_v41 = vand.u32 127, %v131_v40 }
   0x9   :  { %695 = vmatprep.subr.bf16.mxu0 %v823_v3  ;;  %v705_v19 = vpack.c.bf16 %v45_v18, %v44_v17  ;;  %v708_v22 = vpack.c.bf16 %v47_v21, %v46_v20  ;;  %v48_v23 = vld [vmem:[%s1146_s1 + $0x70] sm:$0xff]  ;;  %v49_v24 = vld [vmem:[%s1146_s1 + $0x78] sm:$0xff]  ;;  %v33_v26 = vld [vmem:[%s1145_s0] sm:$0xff] }
   0xa   :  { %v711_v25 = vpack.c.bf16 %v49_v24, %v48_v23  ;;  %v477_v27 = vld [vmem:[%s1147_s2] ss:$0 sm:$0xff]  ;;  %v144_v32 = vld [vmem:[%s1148_s3 + $0x8] sm:$0xff]  ;;  %v145_v33 = vld [vmem:[%s1148_s3 + $0x10] sm:$0xff]  ;;  %vm133_vm1 = vcmp.lt.s32.totalorder %v968_v41, 32 }
   0xb   :  { %v143_v31 = vld [vmem:[%s1148_s3] sm:$0xff]  ;;  %v146_v35 = vld [vmem:[%s1148_s3 + $0x18] sm:$0xff]  ;;  %v148_v38 = vld [vmem:[%s1148_s3 + $0x28] sm:$0xff] }
   0xc   :  { %697 = vmatpush3.bf16.msra.mxu0 %v696_v10  ;;  %v714_v34 = vpack.c.bf16 %v144_v32, %v143_v31  ;;  %v717_v36 = vpack.c.bf16 %v146_v35, %v145_v33  ;;  %v147_v37 = vld [vmem:[%s1148_s3 + $0x20] sm:$0xff]  ;;  %v149_v47 = vld [vmem:[%s1148_s3 + $0x30] sm:$0xff]  ;;  %v150_v48 = vld [vmem:[%s1148_s3 + $0x38] sm:$0xff] }
   0xd   :  { %698 = vmatprep.subr.bf16.mxu0 %v823_v3  ;;  %v720_v39 = vpack.c.bf16 %v148_v38, %v147_v37  ;;  %v723_v49 = vpack.c.bf16 %v150_v48, %v149_v47  ;;  %v151_v50 = vld [vmem:[%s1148_s3 + $0x40] sm:$0xff]  ;;  %v152_v51 = vld [vmem:[%s1148_s3 + $0x48] sm:$0xff]  ;;  %v153_v53 = vld [vmem:[%s1148_s3 + $0x50] sm:$0xff] }
   0xe   :  { %715 = vmatpush3.bf16.msra.mxu1 %v714_v34  ;;  %v726_v52 = vpack.c.bf16 %v152_v51, %v151_v50  ;;  %v154_v54 = vld [vmem:[%s1148_s3 + $0x58] sm:$0xff]  ;;  %v155_v56 = vld [vmem:[%s1148_s3 + $0x60] sm:$0xff]  ;;  %v156_v57 = vld [vmem:[%s1148_s3 + $0x68] sm:$0xff] }
   0xf   :  { %716 = vmatprep.subr.bf16.mxu1 %v823_v3  ;;  %v729_v55 = vpack.c.bf16 %v154_v54, %v153_v53  ;;  %v732_v58 = vpack.c.bf16 %v156_v57, %v155_v56  ;;  %v157_v59 = vld [vmem:[%s1148_s3 + $0x70] sm:$0xff]  ;;  %v158_v60 = vld [vmem:[%s1148_s3 + $0x78] sm:$0xff]  ;;  %v478_v5 = vld [vmem:[%s1149_s4] ss:$0 sm:$0xff] }
  0x10   :  { %700 = vmatpush3.bf16.msra.mxu0 %v699_v13  ;;  %v735_v61 = vpack.c.bf16 %v158_v60, %v157_v59  ;;  %v249_v10 = vld [vmem:[%s1150_s5] sm:$0xff]  ;;  %v250_v11 = vld [vmem:[%s1150_s5 + $0x8] sm:$0xff]  ;;  %v252_v13 = vld [vmem:[%s1150_s5 + $0x18] sm:$0xff] }
  0x11   :  { %701 = vmatprep.subr.bf16.mxu0 %v823_v3  ;;  %v738_v12 = vpack.c.bf16 %v250_v11, %v249_v10  ;;  %v253_v15 = vld [vmem:[%s1150_s5 + $0x20] sm:$0xff]  ;;  %v255_v23 = vld [vmem:[%s1150_s5 + $0x30] sm:$0xff]  ;;  %v256_v24 = vld [vmem:[%s1150_s5 + $0x38] sm:$0xff] }
  0x12   :  { %718 = vmatpush3.bf16.msra.mxu1 %v717_v36  ;;  %v261_v32 = vld [vmem:[%s1150_s5 + $0x60] sm:$0xff]  ;;  %v262_v33 = vld [vmem:[%s1150_s5 + $0x68] sm:$0xff]  ;;  %v263_v35 = vld [vmem:[%s1150_s5 + $0x70] sm:$0xff] }
  0x13   :  { %719 = vmatprep.subr.bf16.mxu1 %v823_v3  ;;  %v756_v34 = vpack.c.bf16 %v262_v33, %v261_v32  ;;  %v264_v36 = vld [vmem:[%s1150_s5 + $0x78] sm:$0xff]  ;;  %v356_v50 = vld [vmem:[%s1152_s7 + $0x8] sm:$0xff]  ;;  %v357_v51 = vld [vmem:[%s1152_s7 + $0x10] sm:$0xff] }
  0x14   :  { %703 = vmatpush3.bf16.msra.mxu0 %v702_v16  ;;  %v254_v16 = vld [vmem:[%s1150_s5 + $0x28] sm:$0xff]  ;;  %v759_v37 = vpack.c.bf16 %v264_v36, %v263_v35  ;;  %v358_v53 = vld [vmem:[%s1152_s7 + $0x18] sm:$0xff] }
  0x15   :  { %704 = vmatprep.subr.bf16.mxu0 %v823_v3  ;;  %v744_v17 = vpack.c.bf16 %v254_v16, %v253_v15  ;;  %v765_v54 = vpack.c.bf16 %v358_v53, %v357_v51  ;;  %v360_v56 = vld [vmem:[%s1152_s7 + $0x28] sm:$0xff] }
  0x16   :  { %721 = vmatpush3.bf16.msra.mxu1 %v720_v39  ;;  %v364_v41 = vld [vmem:[%s1152_s7 + $0x48] sm:$0xff] }
  0x17   :  { %722 = vmatprep.subr.bf16.mxu1 %v823_v3  ;;  %v368_v10 = vld [vmem:[%s1152_s7 + $0x68] sm:$0xff] }
  0x18   :  { %706 = vmatpush3.bf16.msra.mxu0 %v705_v19 }
  0x19   :  { %707 = vmatprep.subr.bf16.mxu0 %v823_v3 }
  0x1a   :  { %724 = vmatpush3.bf16.msra.mxu1 %v723_v49  ;;  %v355_v49 = vld [vmem:[%s1152_s7] sm:$0xff] }
  0x1b   :  { %725 = vmatprep.subr.bf16.mxu1 %v823_v3 }
  0x1c   :  { %709 = vmatpush3.bf16.msra.mxu0 %v708_v22 }
  0x1d   :  { %710 = vmatprep.subr.bf16.mxu0 %v823_v3 }
  0x1e   :  { %727 = vmatpush3.bf16.msra.mxu1 %v726_v52  ;;  %v762_v52 = vpack.c.bf16 %v356_v50, %v355_v49 }
  0x1f   :  { %728 = vmatprep.subr.bf16.mxu1 %v823_v3 }
  0x20   :  { %712 = vmatpush3.bf16.msra.mxu0 %v711_v25  ;;  %v747_v25 = vpack.c.bf16 %v256_v24, %v255_v23 }
  0x21   :  { %737 = vmatprep.subr.bf16.mxu0 %v823_v3 }
  0x22   :  { %730 = vmatpush3.bf16.msra.mxu1 %v729_v55  ;;  %v359_v55 = vld [vmem:[%s1152_s7 + $0x20] sm:$0xff] }
  0x23   :  { %582 = vmatmul.mubr.f32.vlgmr.msra.gmra.mrb[0].mxu0 %v33_v26  ;;  %731 = vmatprep.subr.bf16.mxu1 %v823_v3  ;;  %v257_v26 = vld [vmem:[%s1150_s5 + $0x40] sm:$0xff]  ;;  %v768_v57 = vpack.c.bf16 %v360_v56, %v359_v55 }
  0x24   :  { %651 = vmatprep.mubr.msk.f32.mxu0 %vm824_vm0, %v825_v6  ;;  %739 = vmatpush3.bf16.msra.mxu0 %v738_v12  ;;  %v370_v12 = vld [vmem:[%s1152_s7 + $0x78] sm:$0xff] }
  0x25   :  { %740 = vmatprep.subr.bf16.mxu0 %v823_v3 }
  0x26   :  { %733 = vmatpush3.bf16.msra.mxu1 %v732_v58 }
  0x27   :  { %734 = vmatprep.subr.bf16.mxu1 %v823_v3 }
  0x2a   :  { %736 = vmatpush3.bf16.msra.mxu1 %v735_v61 }
  0x2b   :  { %761 = vmatprep.subr.bf16.mxu1 %v823_v3 }
  0xf6   :  { %v123_v28 = vpop.f32.mrb[0].mxu0 }
  0xf7   :  { %v124_v29 = vadd.f32 %v477_v27, %v123_v28  ;;  %v583_v30 = vpop.f32.mrb[1].mxu0  ;;  %v258_v27 = vld [vmem:[%s1150_s5 + $0x48] sm:$0xff] }
  0xf8   :  { %v750_v28 = vpack.c.bf16 %v258_v27, %v257_v26  ;;  %v260_v30 = vld [vmem:[%s1150_s5 + $0x58] sm:$0xff] }
  0xf9   :  { %127 = vadd.xlane.f32.xlu0 %v124_v29 }
 0x186   :  { %v128_v42 = vpop.xlane.xlu0 %127 }
 0x187   :  { %v129_v43 = vmul.f32 0.03125, %v128_v42 }
 0x189   :  { %v130_v44 = vsub.f32 %v124_v29, %v129_v43  ;;  %v259_v29 = vld [vmem:[%s1150_s5 + $0x50] sm:$0xff] }
 0x18a   :  { %v753_v31 = vpack.c.bf16 %v260_v30, %v259_v29 }
 0x18b   :  { %v134_v45 = vsel %vm133_vm1, %v130_v44, 0.0 }
 0x18c   :  { %v135_v46 = vmul.f32 %v134_v45, %v134_v45  ;;  %v479_v45 = vld [vmem:[%s1151_s6] ss:$0 sm:$0xff] }
 0x18e   :  { %136 = vadd.xlane.f32.xlu0 %v135_v46 }
 0x21b   :  { %v137_v62 = vpop.xlane.xlu0 %136 }
 0x21c   :  { %v138_v63 = vmul.f32 0.03125, %v137_v62 }
 0x21e   :  { %v139_v0 = vadd.f32 1e-05, %v138_v63  ;;  %v361_v63 = vld [vmem:[%s1152_s7 + $0x30] sm:$0xff] }
 0x220   :  { %789 = vrsqrt.f32 %v139_v0  ;;  %v362_v0 = vld [vmem:[%s1152_s7 + $0x38] sm:$0xff] }
 0x22a   :  { %v790_v1 = vpop.eup %789 }
 0x22b   :  { %v141_v2 = vmul.f32 %v790_v1, %v130_v44  ;;  %v771_v1 = vpack.c.bf16 %v362_v0, %v361_v63 }
 0x22d   :  { %v142_v4 = vmax.f32 %v141_v2, 0.0  ;;  %v363_v2 = vld [vmem:[%s1152_s7 + $0x40] sm:$0xff] }
 0x22f   :  { %617 = vmatmul.mubr.f32.vlgmr.msra.gmra.mrb[0].mxu1 %v142_v4  ;;  %v774_v4 = vpack.c.bf16 %v364_v41, %v363_v2 }
 0x230   :  { %686 = vmatprep.mubr.msk.f32.mxu1 %vm824_vm0, %v825_v6  ;;  %v251_v6 = vld [vmem:[%s1150_s5 + $0x10] sm:$0xff]  ;;  %763 = vmatpush3.bf16.msra.mxu1 %v762_v52 }
 0x231   :  { %v741_v14 = vpack.c.bf16 %v252_v13, %v251_v6  ;;  %764 = vmatprep.subr.bf16.mxu1 %v823_v3  ;;  %v369_v6 = vld [vmem:[%s1152_s7 + $0x70] sm:$0xff] }
 0x232   :  { %v783_v13 = vpack.c.bf16 %v370_v12, %v369_v6 }
 0x233   :  { %742 = vmatpush3.bf16.msra.mxu0 %v741_v14 }
 0x234   :  { %743 = vmatprep.subr.bf16.mxu0 %v823_v3  ;;  %766 = vmatpush3.bf16.msra.mxu1 %v765_v54 }
 0x235   :  { %767 = vmatprep.subr.bf16.mxu1 %v823_v3 }
 0x237   :  { %745 = vmatpush3.bf16.msra.mxu0 %v744_v17 }
 0x238   :  { %746 = vmatprep.subr.bf16.mxu0 %v823_v3  ;;  %769 = vmatpush3.bf16.msra.mxu1 %v768_v57 }
 0x239   :  { %770 = vmatprep.subr.bf16.mxu1 %v823_v3 }
 0x23b   :  { %748 = vmatpush3.bf16.msra.mxu0 %v747_v25 }
 0x23c   :  { %749 = vmatprep.subr.bf16.mxu0 %v823_v3  ;;  %772 = vmatpush3.bf16.msra.mxu1 %v771_v1 }
 0x23d   :  { %773 = vmatprep.subr.bf16.mxu1 %v823_v3 }
 0x23f   :  { %751 = vmatpush3.bf16.msra.mxu0 %v750_v28 }
 0x240   :  { %752 = vmatprep.subr.bf16.mxu0 %v823_v3  ;;  %775 = vmatpush3.bf16.msra.mxu1 %v774_v4 }
 0x241   :  { %776 = vmatprep.subr.bf16.mxu1 %v823_v3 }
 0x243   :  { %754 = vmatpush3.bf16.msra.mxu0 %v753_v31 }
 0x244   :  { %755 = vmatprep.subr.bf16.mxu0 %v823_v3 }
 0x247   :  { %757 = vmatpush3.bf16.msra.mxu0 %v756_v34 }
 0x248   :  { %758 = vmatprep.subr.bf16.mxu0 %v823_v3 }
 0x24b   :  { %760 = vmatpush3.bf16.msra.mxu0 %v759_v37 }
 0x302   :  { %v232_v7 = vpop.f32.mrb[0].mxu1 }
 0x303   :  { %v233_v8 = vadd.f32 %v478_v5, %v232_v7  ;;  %v618_v9 = vpop.f32.mrb[1].mxu1  ;;  %v365_v5 = vld [vmem:[%s1152_s7 + $0x50] sm:$0xff]  ;;  %v366_v7 = vld [vmem:[%s1152_s7 + $0x58] sm:$0xff] }
 0x304   :  { %v367_v9 = vld [vmem:[%s1152_s7 + $0x60] sm:$0xff]  ;;  %s826_s7 = smov [#allocation2]  }
 0x305   :  { %236 = vadd.xlane.f32.xlu1 %v233_v8  ;;  %v780_v11 = vpack.c.bf16 %v368_v10, %v367_v9  ;;  %s469_s21 = sshll.u32 %s826_s7, 4  ;;  %s470_s21 = int_to_ptr.vmem [resolvable:$true] %s469_s21 }
 0x306   :  { %p804_p1 = scmp.lt.s32.totalorder %s470_s21, %s470_s21 }
 0x392   :  { %v237_v18 = vpop.xlane.xlu1 %236 }
 0x393   :  { %v238_v19 = vmul.f32 0.03125, %v237_v18 }
 0x395   :  { %v239_v20 = vsub.f32 %v233_v8, %v238_v19  ;;  %v777_v8 = vpack.c.bf16 %v366_v7, %v365_v5 }
 0x397   :  { %v240_v21 = vsel %vm133_vm1, %v239_v20, 0.0  ;;  %778 = vmatpush3.bf16.msra.mxu1 %v777_v8 }
 0x398   :  { %v241_v22 = vmul.f32 %v240_v21, %v240_v21  ;;  %779 = vmatprep.subr.bf16.mxu1 %v823_v3 }
 0x39a   :  { %242 = vadd.xlane.f32.xlu1 %v241_v22 }
 0x39b   :  { %781 = vmatpush3.bf16.msra.mxu1 %v780_v11 }
 0x39c   :  { %782 = vmatprep.subr.bf16.mxu1 %v823_v3 }
 0x39f   :  { %784 = vmatpush3.bf16.msra.mxu1 %v783_v13 }
 0x427   :  { %v243_v38 = vpop.xlane.xlu1 %242 }
 0x428   :  { %v244_v39 = vmul.f32 0.03125, %v243_v38 }
 0x42a   :  { %v245_v40 = vadd.f32 1e-05, %v244_v39 }
 0x42c   :  { %791 = vrsqrt.f32 %v245_v40 }
 0x436   :  { %v792_v42 = vpop.eup %791 }
 0x437   :  { %v247_v43 = vmul.f32 %v792_v42, %v239_v20  ;;  %v480_v20 = vld [vmem:[%s1153_s8] ss:$0 sm:$0xff]  ;;  %s799_s8 = scalar_lea.vmem %s470_s21, 128 }
 0x438   :  { %p800_p0 = scmp.ne.s32.totalorder %s470_s21, %s799_s8  ;;  %p805_p2 = scmp.lt.s32.totalorder %s799_s8, %s799_s8 }
 0x439   :  { %v248_v44 = vmax.f32 %v247_v43, 0.0 }
 0x43a   :  { %p806_p3 = por %p805_p2, %p804_p1 }
 0x43b   :  { %652 = vmatmul.mubr.f32.vlgmr.msra.gmra.mrb[2].mxu0 %v248_v44 }
 0x43c   :  { %p807_p4 = pnand %p806_p3, %p800_p0 }
 0x50e   :  { %v338_v46 = vpop.f32.mrb[2].mxu0 }
 0x50f   :  { %v339_v47 = vadd.f32 %v479_v45, %v338_v46  ;;  %v653_v48 = vpop.f32.mrb[3].mxu0 }
 0x511   :  { %342 = vadd.xlane.f32.xlu0 %v339_v47 }
 0x59e   :  { %v343_v58 = vpop.xlane.xlu0 %342 }
 0x59f   :  { %v344_v59 = vmul.f32 0.03125, %v343_v58 }
 0x5a1   :  { %v345_v60 = vsub.f32 %v339_v47, %v344_v59 }
 0x5a3   :  { %v346_v61 = vsel %vm133_vm1, %v345_v60, 0.0 }
 0x5a4   :  { %v347_v62 = vmul.f32 %v346_v61, %v346_v61 }
 0x5a6   :  { %348 = vadd.xlane.f32.xlu1 %v347_v62 }
 0x633   :  { %v349_v14 = vpop.xlane.xlu1 %348 }
 0x634   :  { %v350_v15 = vmul.f32 0.03125, %v349_v14 }
 0x636   :  { %v351_v16 = vadd.f32 1e-05, %v350_v15 }
 0x638   :  { %793 = vrsqrt.f32 %v351_v16 }
 0x642   :  { %v794_v17 = vpop.eup %793 }
 0x643   :  { %v353_v18 = vmul.f32 %v794_v17, %v345_v60 }
 0x645   :  { %v354_v19 = vmax.f32 %v353_v18, 0.0 }
 0x647   :  { %687 = vmatmul.mubr.f32.vlgmr.msra.gmra.mrb[2].mxu1 %v354_v19 }
 0x71a   :  { %v444_v21 = vpop.f32.mrb[2].mxu1 }
 0x71b   :  { %v445_v22 = vadd.f32 %v480_v20, %v444_v21  ;;  %v688_v23 = vpop.f32.mrb[3].mxu1 }
 0x71d   :  { %v448_v24 = vmin.f32 %v445_v22, 20.0  ;;  %vm460_vm3 = vcmp.gt.f32.partialorder %v445_v22, 20.0 }
 0x71f   :  { %v449_v25 = vmul.f32 1.442695, %v448_v24 }
 0x721   :  { %795 = vpow2.f32 %v449_v25 }
 0x72b   :  { %v796_v3 = vpop.eup %795 }
 0x72c   :  { %v451_v26 = vadd.f32 1.0, %v796_v3  ;;  %v454_v27 = vmul.f32 -0.5, %v796_v3  ;;  %v457_v29 = vand.u32 2147483647, %v796_v3 }
 0x72e   :  { %797 = vlog2.f32 %v451_v26  ;;  %v455_v28 = vadd.f32 1.0, %v454_v27  ;;  %vm458_vm2 = vcmp.lt.f32.partialorder %v457_v29, 0.0004427343 }
 0x730   :  { %v456_v32 = vmul.f32 %v796_v3, %v455_v28 }
 0x738   :  { %v798_v30 = vpop.eup %797 }
 0x739   :  { %v453_v31 = vmul.f32 0.6931472, %v798_v30 }
 0x73b   :  { %v459_v33 = vsel %vm458_vm2, %v456_v32, %v453_v31 }
 0x73c   :  { %v461_v34 = vsel %vm460_vm3, %v445_v22, %v459_v33 }
 0x73d   :  { %462 = vst [vmem:[#allocation2] sm:$0xff] %v461_v34 }
 0x73e   :  { %810 = shalt.err (!%p807_p4)
}
 0x73f   :  { %s811_s23 = scalar_lea.hbm %s1154_s9, 128 }
 0x740   :  { %p812_p5 = scmp.ne.s32.totalorder %s1154_s9, %s811_s23  ;;  %p815_p6 = scmp.lt.u32.totalorder %s811_s23, %s1154_s9 }
 0x742   :  { %p817_p7 = pnand %p815_p6, %p812_p5 }
 0x744   :  { %820 = shalt.err (!%p817_p7)
}
 0x745   :  { %472 = dma.vmem_to_hbm [thread:$0]  %s470_s21, 128, %s1154_s9, [#allocation3]  }
 0x746   :  { %821 = dma.done.wait [#allocation3], 128  }
 0x747   :  { %822 = vsyncadd [#allocation3], 4294967168 }
 0x748   :  { %476 = vsyncpa [#allocation3], 1 }

</bundles_post_ra>
